<compile_context>
chip_gen: v7x
topology: tpu7x:2x2x1
jax: 0.10.0
libtpu: 0.0.40
codegen_flags: <defaults>
</compile_context>

<pallas_src>
import jax
import jax.numpy as jnp
from jax import lax
from jax.experimental import pallas as pl
from jax.experimental.pallas import tpu as pltpu


def _mlp_kernel(x_ref,
                w1_ref, b1_ref,
                w2_ref, b2_ref,
                w3_ref, b3_ref,
                o_ref):
    x = x_ref[...].astype(jnp.float32)                       # (tm, D), batch on sublanes

    # Layer 1: h1 = W1' @ x^T, expressed as A @ B^T (contract last-with-last)
    # so the MXU consumes the (tm, D) tile directly -> (H1, tm), batch on lanes.
    h1 = lax.dot_general(
        w1_ref[...], x,
        dimension_numbers=(((1,), (1,)), ((), ())),
        preferred_element_type=jnp.float32)                  # (H1, tm)
    h1 = jnp.maximum(h1 + b1_ref[...], 0.0)
    # TODO(synk): training-mode Dropout(0.3)/BatchNorm batch-stats not reproduced; eval-mode math only.

    # Layer 2: (H2, H1) @ (H1, tm) -> (H2, tm), still lane-dense.
    h2 = jnp.dot(w2_ref[...], h1, preferred_element_type=jnp.float32)
    h2 = jnp.maximum(h2 + b2_ref[...], 0.0)

    # Output head Linear(H2, 1): VPU multiply + sublane reduce -> lane-dense
    # (1, tm) row (no 1-column MXU matmul, no 1-lane masked stores).
    out = jnp.sum(h2 * w3_ref[...], axis=0, keepdims=True) + b3_ref[...]
    o_ref[...] = out.astype(o_ref.dtype)


def _fold_batchnorm(params):
    """Fold eval-mode BatchNorm into the Linear weights and transpose to (out, in)."""
    w1 = (params["w1"] * params["s1"]).T                       # (H1, D)
    b1 = (params["b1"] * params["s1"] + params["t1"]).T        # (H1, 1)
    w2 = (params["w2"] * params["s2"]).T                       # (H2, H1)
    b2 = (params["b2"] * params["s2"] + params["t2"]).T        # (H2, 1)
    w3 = params["w3"]                                          # (H2, 1) column
    b3 = params["b3"]                                          # (1, 1)
    return (w1, b1, w2, b2, w3, b3)


def neural_meta_learner_forward(x, params, *, tile_m=4096):
    """Forward pass of the meta-learner MLP as a single Pallas kernel.

    The batch is streamed over a 1-D grid of tm-row tiles; folded weights stay
    VMEM-resident.  Small batches (B <= tile_m) run as one full block, which
    lifts all (8,128) divisibility constraints (block == full array).
    """
    x = jnp.asarray(x, jnp.float32)
    B, D = x.shape
    weights = _fold_batchnorm(params)

    if B <= tile_m:
        tm = B                                   # single full block
    else:
        # lane-multiple tile <= B so only the final block is partial.
        tm = max(128, min((int(tile_m) // 128) * 128, (B // 128) * 128))
    num_tiles = pl.cdiv(B, tm)
    padded = num_tiles * tm
    # NOTE(v7x): with 2 TensorCores, prefer a tile_m that makes num_tiles even
    # and >= ~8 so the "parallel" grid axis load-balances across cores.

    def resident_spec(a):
        # Constant block index: DMA'd once, VMEM-resident across all grid steps.
        return pl.BlockSpec(a.shape, lambda i: (0,) * a.ndim)

    out = pl.pallas_call(
        _mlp_kernel,
        out_shape=jax.ShapeDtypeStruct((1, padded), jnp.float32),
        grid=(num_tiles,),
        in_specs=[pl.BlockSpec((tm, D), lambda i: (i, 0))]
                 + [resident_spec(a) for a in weights],
        out_specs=pl.BlockSpec((1, tm), lambda i: (0, i)),
        compiler_params=pltpu.CompilerParams(
            dimension_semantics=("parallel",),
        ),
    )(x, *weights)
    # Lane-dense (1, padded) row back to the PyTorch-shaped (B, 1) column.
    return out.reshape(padded, 1)[:B]


def init_params(key, input_dim, hidden_dims=(40, 20)):
    """Deterministic parameter init mirroring the PyTorch module's shapes.

    Linear weights stored as (in, out) = W_pt.T.  BatchNorm (eval mode):
    gamma=1, beta=0, running_mean=0, running_var=1, eps=1e-5, expressed as a
    per-feature scale s = gamma / sqrt(var + eps) and shift t = beta - mean*s
    (folded into the Linear weights at call time).
    """
    eps = 1e-5
    dims = [input_dim] + list(hidden_dims) + [1]
    keys = jax.random.split(key, 2 * (len(dims) - 1))
    params = {}
    for i in range(len(dims) - 1):
        d_in, d_out = dims[i], dims[i + 1]
        bound = 1.0 / jnp.sqrt(d_in)
        w = jax.random.uniform(keys[2 * i], (d_in, d_out), jnp.float32, -bound, bound)
        b = jax.random.uniform(keys[2 * i + 1], (1, d_out), jnp.float32, -bound, bound)
        params[f"w{i + 1}"] = w
        params[f"b{i + 1}"] = b
        if i < len(hidden_dims):  # batchnorm only after hidden layers
            gamma = jnp.ones((1, d_out), jnp.float32)
            beta = jnp.zeros((1, d_out), jnp.float32)
            running_mean = jnp.zeros((1, d_out), jnp.float32)
            running_var = jnp.ones((1, d_out), jnp.float32)
            scale = gamma / jnp.sqrt(running_var + eps)
            shift = beta - running_mean * scale
            params[f"s{i + 1}"] = scale
            params[f"t{i + 1}"] = shift
    return params


def _reference_forward(x, params):
    """Pure-JAX reference of the unfused eval-mode math."""
    h1 = jnp.maximum((x @ params["w1"] + params["b1"]) * params["s1"] + params["t1"], 0.0)
    h2 = jnp.maximum((h1 @ params["w2"] + params["b2"]) * params["s2"] + params["t2"], 0.0)
    return h2 @ params["w3"] + params["b3"]


if __name__ == "__main__":
    key = jax.random.PRNGKey(0)
    k_x_small, k_x_big, k_p = jax.random.split(key, 3)

    D = 8  # input_dim = number of stacked Level-0 predictions
    params = init_params(k_p, input_dim=D, hidden_dims=(40, 20))

    # Small batch -> single full block (inference-sized).
    B_small = 8
    x_small = jax.random.normal(k_x_small, (B_small, D), dtype=jnp.float32)
    out_small = neural_meta_learner_forward(x_small, params)
    jax.block_until_ready(out_small)
    ref_small = _reference_forward(x_small, params)
    assert out_small.shape == (B_small, 1)
    assert jnp.allclose(out_small, ref_small, atol=1e-4, rtol=1e-5)

    # Larger, non-multiple-of-tile batch -> tiled path with a partial tail block.
    B_big = 1000
    x_big = jax.random.normal(k_x_big, (B_big, D), dtype=jnp.float32)
    out_big = neural_meta_learner_forward(x_big, params, tile_m=512)
    jax.block_until_ready(out_big)
    ref_big = _reference_forward(x_big, params)
    assert out_big.shape == (B_big, 1)
    assert jnp.allclose(out_big, ref_big, atol=1e-4, rtol=1e-5)

    print("KERNEL_OK")
</pallas_src>

<mosaic_0001>
module attributes {stable_mosaic.version = 11 : i64} {
  func.func @_mlp_kernel(%arg0: i32, %arg1: memref<8x8xf32, #tpu.memory_space<vmem>>, %arg2: memref<40x8xf32, #tpu.memory_space<vmem>>, %arg3: memref<40x1xf32, #tpu.memory_space<vmem>>, %arg4: memref<20x40xf32, #tpu.memory_space<vmem>>, %arg5: memref<20x1xf32, #tpu.memory_space<vmem>>, %arg6: memref<20x1xf32, #tpu.memory_space<vmem>>, %arg7: memref<1x1xf32, #tpu.memory_space<vmem>>, %arg8: memref<1x8xf32, #tpu.memory_space<vmem>>) attributes {dimension_semantics = [#tpu.dimension_semantics<parallel>], iteration_bounds = array<i64: 1>, scalar_prefetch = 0 : i64, scratch_operands = 0 : i64, tpu.core_type = #tpu.core_type<tc>, window_params = [{transform_indices = @transform_0, window_bounds = array<i64: 8, 8>}, {pipeline_mode = #tpu.pipeline_mode<synchronous>, transform_indices = @transform_1, window_bounds = array<i64: 40, 8>}, {pipeline_mode = #tpu.pipeline_mode<synchronous>, transform_indices = @transform_2, window_bounds = array<i64: 40, 1>}, {pipeline_mode = #tpu.pipeline_mode<synchronous>, transform_indices = @transform_3, window_bounds = array<i64: 20, 40>}, {pipeline_mode = #tpu.pipeline_mode<synchronous>, transform_indices = @transform_4, window_bounds = array<i64: 20, 1>}, {pipeline_mode = #tpu.pipeline_mode<synchronous>, transform_indices = @transform_5, window_bounds = array<i64: 20, 1>}, {pipeline_mode = #tpu.pipeline_mode<synchronous>, transform_indices = @transform_6, window_bounds = array<i64: 1, 1>}, {transform_indices = @transform_7, window_bounds = array<i64: 1, 8>}]} {
    %c0 = arith.constant 0 : index
    %c0_0 = arith.constant 0 : index
    %0 = vector.load %arg1[%c0, %c0_0] : memref<8x8xf32, #tpu.memory_space<vmem>>, vector<8x8xf32>
    %c0_1 = arith.constant 0 : index
    %c0_2 = arith.constant 0 : index
    %1 = vector.load %arg2[%c0_1, %c0_2] : memref<40x8xf32, #tpu.memory_space<vmem>>, vector<40x8xf32>
    %cst = arith.constant dense<0.000000e+00> : vector<40x8xf32>
    %2 = tpu.matmul %1, %0, %cst {dimension_numbers = #tpu.dot_dimension_numbers<[1], [1], [0], [0], [0, 0, 1, 0], [], []>} : vector<40x8xf32>, vector<8x8xf32>, vector<40x8xf32> -> vector<40x8xf32>
    %c0_3 = arith.constant 0 : index
    %c0_4 = arith.constant 0 : index
    %3 = vector.load %arg3[%c0_3, %c0_4] : memref<40x1xf32, #tpu.memory_space<vmem>>, vector<40x1xf32>
    %4 = vector.broadcast %3 : vector<40x1xf32> to vector<40x8xf32>
    %5 = arith.addf %2, %4 : vector<40x8xf32>
    %cst_5 = arith.constant 0.000000e+00 : f32
    %6 = vector.broadcast %cst_5 : f32 to vector<40x8xf32>
    %7 = arith.maximumf %5, %6 : vector<40x8xf32>
    %c0_6 = arith.constant 0 : index
    %c0_7 = arith.constant 0 : index
    %8 = vector.load %arg4[%c0_6, %c0_7] : memref<20x40xf32, #tpu.memory_space<vmem>>, vector<20x40xf32>
    %cst_8 = arith.constant dense<0.000000e+00> : vector<20x8xf32>
    %9 = tpu.matmul %8, %7, %cst_8 {dimension_numbers = #tpu.dot_dimension_numbers<[1], [0], [0], [1], [0, 0, 1, 1], [], []>} : vector<20x40xf32>, vector<40x8xf32>, vector<20x8xf32> -> vector<20x8xf32>
    %c0_9 = arith.constant 0 : index
    %c0_10 = arith.constant 0 : index
    %10 = vector.load %arg5[%c0_9, %c0_10] : memref<20x1xf32, #tpu.memory_space<vmem>>, vector<20x1xf32>
    %11 = vector.broadcast %10 : vector<20x1xf32> to vector<20x8xf32>
    %12 = arith.addf %9, %11 : vector<20x8xf32>
    %cst_11 = arith.constant 0.000000e+00 : f32
    %13 = vector.broadcast %cst_11 : f32 to vector<20x8xf32>
    %14 = arith.maximumf %12, %13 : vector<20x8xf32>
    %c0_12 = arith.constant 0 : index
    %c0_13 = arith.constant 0 : index
    %15 = vector.load %arg6[%c0_12, %c0_13] : memref<20x1xf32, #tpu.memory_space<vmem>>, vector<20x1xf32>
    %16 = vector.broadcast %15 : vector<20x1xf32> to vector<20x8xf32>
    %17 = arith.mulf %14, %16 : vector<20x8xf32>
    %cst_14 = arith.constant dense<0.000000e+00> : vector<8xf32>
    %18 = vector.multi_reduction <add>, %17, %cst_14 [0] : vector<20x8xf32> to vector<8xf32>
    %19 = vector.shape_cast %18 : vector<8xf32> to vector<1x8xf32>
    %c0_15 = arith.constant 0 : index
    %c0_16 = arith.constant 0 : index
    %20 = vector.load %arg7[%c0_15, %c0_16] : memref<1x1xf32, #tpu.memory_space<vmem>>, vector<1x1xf32>
    %21 = vector.broadcast %20 : vector<1x1xf32> to vector<1x8xf32>
    %22 = arith.addf %19, %21 : vector<1x8xf32>
    %c0_17 = arith.constant 0 : index
    %c0_18 = arith.constant 0 : index
    %23 = vector.load %arg8[%c0_17, %c0_18] : memref<1x8xf32, #tpu.memory_space<vmem>>, vector<1x8xf32>
    tpu.vector_store %arg8[%c0_17, %c0_18], %22 {strides = array<i32>} : memref<1x8xf32, #tpu.memory_space<vmem>>, vector<1x8xf32>,
    return
  }
  func.func @transform_0(%arg0: i32) -> (i32, i32) {
    %c0_i32 = arith.constant 0 : i32
    %c0_i32_0 = arith.constant 0 : i32
    return %arg0, %c0_i32 : i32, i32
  }
  func.func @transform_1(%arg0: i32) -> (i32, i32) {
    %c0_i32 = arith.constant 0 : i32
    %c0_i32_0 = arith.constant 0 : i32
    %c0_i32_1 = arith.constant 0 : i32
    return %c0_i32, %c0_i32_0 : i32, i32
  }
  func.func @transform_2(%arg0: i32) -> (i32, i32) {
    %c0_i32 = arith.constant 0 : i32
    %c0_i32_0 = arith.constant 0 : i32
    %c0_i32_1 = arith.constant 0 : i32
    return %c0_i32, %c0_i32_0 : i32, i32
  }
  func.func @transform_3(%arg0: i32) -> (i32, i32) {
    %c0_i32 = arith.constant 0 : i32
    %c0_i32_0 = arith.constant 0 : i32
    %c0_i32_1 = arith.constant 0 : i32
    return %c0_i32, %c0_i32_0 : i32, i32
  }
  func.func @transform_4(%arg0: i32) -> (i32, i32) {
    %c0_i32 = arith.constant 0 : i32
    %c0_i32_0 = arith.constant 0 : i32
    %c0_i32_1 = arith.constant 0 : i32
    return %c0_i32, %c0_i32_0 : i32, i32
  }
  func.func @transform_5(%arg0: i32) -> (i32, i32) {
    %c0_i32 = arith.constant 0 : i32
    %c0_i32_0 = arith.constant 0 : i32
    %c0_i32_1 = arith.constant 0 : i32
    return %c0_i32, %c0_i32_0 : i32, i32
  }
  func.func @transform_6(%arg0: i32) -> (i32, i32) {
    %c0_i32 = arith.constant 0 : i32
    %c0_i32_0 = arith.constant 0 : i32
    %c0_i32_1 = arith.constant 0 : i32
    return %c0_i32, %c0_i32_0 : i32, i32
  }
  func.func @transform_7(%arg0: i32) -> (i32, i32) {
    %c0_i32 = arith.constant 0 : i32
    %c0_i32_0 = arith.constant 0 : i32
    return %c0_i32, %arg0 : i32, i32
  }
}

</mosaic_0001>

<bundles_post_ra>
// kernel: tpu_custom_call.1
= control target key start
LH: loop header
LB: loop body
LE: loop exit
PB: predicated region body
PF: predicated region fallthrough
CT: control target
= control target key end

     0   :  { %s595_s0 = inlined_call_operand.vmem [shape: f32[8,8], index: 0, kind: input, shape index: {}]   ;;  %s596_s1 = inlined_call_operand.vmem [shape: f32[40,8], index: 1, kind: input, shape index: {}]   ;;  %s597_s2 = inlined_call_operand.vmem [shape: f32[40,1], index: 2, kind: input, shape index: {}]   ;;  %s598_s3 = inlined_call_operand.vmem [shape: f32[20,40], index: 3, kind: input, shape index: {}]   ;;  %s599_s4 = inlined_call_operand.vmem [shape: f32[20,1], index: 4, kind: input, shape index: {}]   ;;  %s600_s5 = inlined_call_operand.vmem [shape: f32[20,1], index: 5, kind: input, shape index: {}]   ;;  %s601_s6 = inlined_call_operand.<no memory space> [shape: f32[1,1], index: 6, kind: input, shape index: {}]   ;;  %s602_s7 = inlined_call_operand.hbm [shape: f32[1,8], index: 7, kind: output, shape index: {}]  }
   0x1   :  { %v12_v0 = vstv %s601_s6 }
   0x2   :  { %13 = vst [vmem:[#allocation2] sm:$0x1] %v12_v0 }
   0x3   :  { %v29_v1 = vld [vmem:[%s595_s0] sm:$0xff]  ;;  %vm65_vm0 = vcmask 64512   ;;  %v449_v2 = vmov 0.0   ;;  %vm450_vm1 = vmmov 0   ;;  %v451_v4 = vmov 0   ;;  %v37_v6 = vld [vmem:[%s597_s2 + $0x10] sm:$0xff] }
   0x4   :  { %376 = vmatprep.subr.mxu0 %v449_v2  ;;  %378 = vmatprep.mubr.msk.f32.mxu0 %vm450_vm1, %v449_v2  ;;  %v30_v3 = vld [vmem:[%s596_s1] sm:$0xff]  ;;  %v36_v7 = vld [vmem:[%s597_s2 + $0x8] sm:$0xff]  ;;  %v38_v8 = vld [vmem:[%s597_s2 + $0x18] sm:$0xff] }
   0x5   :  { %377 = vmatpush3.xpose.msk.msra.mxu0 %vm65_vm0, %v29_v1  ;;  %423 = vset.pattern.permute.xlu0 %v451_v4  ;;  %v35_v5 = vld [vmem:[%s597_s2] sm:$0xff]  ;;  %v31_v9 = vld [vmem:[%s596_s1 + $0x8] sm:$0xff] }
   0x6   :  { %42 = vperm.xlu0 %423, %v35_v5   ;;  %424 = vset.pattern.permute.xlu1 %v451_v4 }
   0x7   :  { %52 = vperm.xlu1 %424, %v37_v6   ;;  %403 = vmatprep.mubr.msk.f32.mxu1 %vm450_vm1, %v449_v2 }
   0x8   :  { %379 = vmatmul.mubr.msk.f32.vlgmr.msra.gmra.mrb[0].mxu0 %vm65_vm0, %v30_v3 }
   0x9   :  { %381 = vmatprep.mubr.msk.f32.mxu0 %vm450_vm1, %v449_v2 }
   0xa   :  { %14 = vsyncpa [#allocation4], 0  ;;  %47 = vperm.xlu0 %423, %v36_v7   ;;  %v39_v10 = vld [vmem:[%s597_s2 + $0x20] sm:$0xff]  ;;  %v32_v12 = vld [vmem:[%s596_s1 + $0x10] sm:$0xff]  ;;  %v452_v21 = vmov 0.0|0.0   ;;  %vm200_vm2 = vcmask 326656  }
   0xb   :  { %57 = vperm.xlu1 %424, %v38_v8   ;;  %v182_v11 = vld [vmem:[%s599_s4] sm:$0xff]  ;;  %v183_v13 = vld [vmem:[%s599_s4 + $0x8] sm:$0xff]  ;;  %v184_v14 = vld [vmem:[%s599_s4 + $0x10] sm:$0xf]  ;;  %412 = vmatprep.subr.bf16.mxu1 %v452_v21  ;;  %vm317_vm3 = vcmask 60416   ;;  %vm337_vm4 = vcmask 57344  }
   0xc   :  { %382 = vmatmul.mubr.msk.f32.gmra.mrb[2].mxu0 %vm65_vm0, %v31_v9  ;;  %v33_v15 = vld [vmem:[%s596_s1 + $0x18] sm:$0xff]  ;;  %v293_v16 = vld [vmem:[%s600_s5] sm:$0xff]  ;;  %v294_v17 = vld [vmem:[%s600_s5 + $0x8] sm:$0xff] }
   0xd   :  { %384 = vmatprep.mubr.msk.f32.mxu0 %vm450_vm1, %v449_v2  ;;  %v34_v18 = vld [vmem:[%s596_s1 + $0x20] sm:$0xff]  ;;  %v295_v19 = vld [vmem:[%s600_s5 + $0x10] sm:$0xf]  ;;  %v180_v50 = vld [vmem:[%s598_s3 + $0x8] sm:$0xff] }
   0xe   :  { %62 = vperm.xlu0 %423, %v39_v10   ;;  %v326_v20 = vld [vmem:[#allocation2] sm:$0x1]  ;;  %v181_v51 = vld [vmem:[%s598_s3 + $0x10] sm:$0xf] }
   0xf   :  { %187 = vperm.xlu1 %424, %v182_v11   ;;  %v179_v49 = vld [vmem:[%s598_s3] sm:$0xff]  ;;  %s453_s3 = smov [#allocation3]  }
  0x10   :  { %385 = vmatmul.mubr.msk.f32.gmra.mrb[4].mxu0 %vm65_vm0, %v32_v12  ;;  %s345_s12 = sshll.u32 %s453_s3, 4  ;;  %s346_s12 = int_to_ptr.vmem [resolvable:$true] %s345_s12 }
  0x11   :  { %387 = vmatprep.mubr.msk.f32.mxu0 %vm450_vm1, %v449_v2  ;;  %s425_s13 = scalar_lea.vmem %s346_s12, 16  ;;  %s429_s14 = scalar_lea.vmem %s346_s12, 32 }
  0x12   :  { %192 = vperm.xlu0 %423, %v183_v13   ;;  %v332_v13 = vlaneseq  ;;  %p426_p0 = scmp.ne.s32.totalorder %s346_s12, %s425_s13  ;;  %p430_p1 = scmp.lt.s32.totalorder %s346_s12, %s346_s12 }
  0x13   :  { %197 = vperm.xlu1 %424, %v184_v14   ;;  %p431_p2 = scmp.lt.s32.totalorder %s429_s14, %s425_s13 }
  0x14   :  { %388 = vmatmul.mubr.msk.f32.gmra.mrb[6].mxu0 %vm65_vm0, %v33_v15 }
  0x15   :  { %390 = vmatprep.mubr.msk.f32.mxu0 %vm450_vm1, %v449_v2  ;;  %p432_p3 = por %p431_p2, %p430_p1 }
  0x16   :  { %298 = vperm.xlu0 %423, %v293_v16   ;;  %v333_v16 = vshrl.u32 %v332_v13, 7 }
  0x17   :  { %303 = vperm.xlu1 %424, %v294_v17   ;;  %p433_p4 = pnand %p432_p3, %p426_p0 }
  0x18   :  { %391 = vmatmul.mubr.msk.f32.gmra.mrb[8].mxu0 %vm65_vm0, %v34_v18 }
  0x1a   :  { %308 = vperm.xlu0 %423, %v295_v19   ;;  %v334_v19 = vsub.s32 0, %v333_v16 }
  0x1b   :  { %329 = vperm.xlu1 %424, %v326_v20  }
  0x85   :  { %v43_v22 = vpop.permute.xlu0 %42 }
  0x86   :  { %v53_v30 = vpop.permute.xlu1 %52 }
  0x89   :  { %v48_v26 = vpop.permute.xlu0 %47 }
  0x8a   :  { %v58_v37 = vpop.permute.xlu1 %57 }
  0x8d   :  { %v63_v43 = vpop.permute.xlu0 %62 }
  0x8e   :  { %v188_v52 = vpop.permute.xlu1 %187 }
  0x91   :  { %v193_v53 = vpop.permute.xlu0 %192 }
  0x92   :  { %v198_v57 = vpop.permute.xlu1 %197 }
  0x95   :  { %v299_v62 = vpop.permute.xlu0 %298 }
  0x96   :  { %v304_v1 = vpop.permute.xlu1 %303 }
  0x99   :  { %v309_v9 = vpop.permute.xlu0 %308 }
  0xdb   :  { %v150_v23 = vpop.f32.mrb[0].mxu0 }
  0xdc   :  { %v380_v24 = vpop.f32.mrb[1].mxu0  ;;  %v151_v25 = vadd.f32 %v150_v23, %v43_v22 }
  0xde   :  { %v174_v31 = vmax.f32 %v151_v25, 0.0 }
  0xdf   :  { %v155_v27 = vpop.f32.mrb[2].mxu0 }
  0xe0   :  { %v156_v28 = vadd.f32 %v155_v27, %v48_v26  ;;  %v383_v29 = vpop.f32.mrb[3].mxu0 }
  0xe2   :  { %v175_v32 = vmax.f32 %v156_v28, 0.0 }
  0xe3   :  { %v160_v33 = vpop.f32.mrb[4].mxu0 }
  0xe4   :  { %v386_v34 = vpop.f32.mrb[5].mxu0  ;;  %v413_v35 = vpack.c.bf16 %v175_v32, %v174_v31  ;;  %v161_v36 = vadd.f32 %v160_v33, %v53_v30 }
  0xe6   :  { %414 = vmatpush3.bf16.msra.mxu1 %v413_v35  ;;  %v176_v41 = vmax.f32 %v161_v36, 0.0 }
  0xe7   :  { %v165_v38 = vpop.f32.mrb[6].mxu0  ;;  %415 = vmatprep.subr.bf16.mxu1 %v452_v21  ;;  %v330_v21 = vpop.permute.xlu1 %329 }
  0xe8   :  { %v166_v39 = vadd.f32 %v165_v38, %v58_v37  ;;  %v389_v40 = vpop.f32.mrb[7].mxu0  ;;  %v335_v23 = vrot.slane %v330_v21, %v334_v19 }
  0xea   :  { %v177_v42 = vmax.f32 %v166_v39, 0.0 }
  0xeb   :  { %v170_v44 = vpop.f32.mrb[8].mxu0 }
  0xec   :  { %v416_v45 = vpack.c.bf16 %v177_v42, %v176_v41  ;;  %v171_v46 = vadd.f32 %v170_v44, %v63_v43  ;;  %v392_v47 = vpop.f32.mrb[9].mxu0 }
  0xee   :  { %417 = vmatpush3.bf16.msra.mxu1 %v416_v45  ;;  %v178_v48 = vmax.f32 %v171_v46, 0.0 }
  0xef   :  { %401 = vmatprep.subr.mxu1 %v449_v2 }
  0xf2   :  { %402 = vmatpush3.msra.mxu1 %v178_v48 }
  0xf3   :  { %404 = vmatmul.mubr.msk.f32.vlgmr.msra.gmra.mrb[0].mxu1 %vm200_vm2, %v179_v49 }
  0xf4   :  { %406 = vmatprep.mubr.msk.f32.mxu1 %vm450_vm1, %v449_v2 }
  0xf7   :  { %407 = vmatmul.mubr.msk.f32.gmra.mrb[2].mxu1 %vm200_vm2, %v180_v50 }
  0xf8   :  { %409 = vmatprep.mubr.msk.f32.mxu1 %vm450_vm1, %v449_v2 }
  0xfb   :  { %410 = vmatmul.mubr.msk.f32.gmra.mrb[4].mxu1 %vm200_vm2, %v181_v51 }
 0x1c6   :  { %v276_v54 = vpop.f32.mrb[0].mxu1 }
 0x1c7   :  { %v277_v55 = vadd.f32 %v276_v54, %v188_v52  ;;  %v405_v56 = vpop.f32.mrb[1].mxu1 }
 0x1c9   :  { %v290_v58 = vmax.f32 %v277_v55, 0.0 }
 0x1ca   :  { %v281_v59 = vpop.f32.mrb[2].mxu1 }
 0x1cb   :  { %v282_v60 = vadd.f32 %v281_v59, %v193_v53  ;;  %v408_v61 = vpop.f32.mrb[3].mxu1  ;;  %v311_v63 = vmul.f32 %v299_v62, %v290_v58 }
 0x1cd   :  { %v291_v0 = vmax.f32 %v282_v60, 0.0  ;;  %v314_v6 = vsel %vm65_vm0, %v311_v63, 0.0 }
 0x1ce   :  { %v286_v2 = vpop.f32.mrb[4].mxu1 }
 0x1cf   :  { %v312_v3 = vmul.f32 %v304_v1, %v291_v0  ;;  %v287_v4 = vadd.f32 %v286_v2, %v198_v57  ;;  %v411_v5 = vpop.f32.mrb[5].mxu1 }
 0x1d1   :  { %v315_v7 = vsel %vm65_vm0, %v312_v3, 0.0  ;;  %v292_v8 = vmax.f32 %v287_v4, 0.0 }
 0x1d2   :  { %v316_v10 = vadd.f32 %v315_v7, %v314_v6 }
 0x1d3   :  { %v313_v11 = vmul.f32 %v309_v9, %v292_v8 }
 0x1d5   :  { %v318_v12 = vsel %vm317_vm3, %v313_v11, 0.0 }
 0x1d6   :  { %v319_v14 = vadd.f32 %v318_v12, %v316_v10 }
 0x1d8   :  { %v320_v15 = vrot.slane %v319_v14, 4 }
 0x1da   :  { %v321_v17 = vadd.f32 %v320_v15, %v319_v14 }
 0x1dc   :  { %v322_v18 = vrot.slane %v321_v17, 2 }
 0x1de   :  { %v323_v20 = vadd.f32 %v322_v18, %v321_v17 }
 0x1e0   :  { %v324_v22 = vrot.slane %v323_v20, 1 }
 0x1e2   :  { %v325_v24 = vadd.f32 %v324_v22, %v323_v20 }
 0x1e4   :  { %v336_v25 = vadd.f32 %v335_v23, %v325_v24 }
 0x1e6   :  { %338 = vst.msk [vmem:[#allocation3] sm:$0x1] %vm337_vm4, %v336_v25 }
 0x1e7   :  { %436 = shalt.err (!%p433_p4)
}
 0x1e8   :  { %s437_s17 = scalar_lea.hbm %s602_s7, 16 }
 0x1e9   :  { %p438_p5 = scmp.ne.s32.totalorder %s602_s7, %s437_s17  ;;  %p441_p6 = scmp.lt.u32.totalorder %s437_s17, %s602_s7 }
 0x1eb   :  { %p443_p7 = pnand %p441_p6, %p438_p5 }
 0x1ed   :  { %446 = shalt.err (!%p443_p7)
}
 0x1ee   :  { %348 = dma.vmem_to_hbm [thread:$0]  %s346_s12, 16, %s602_s7, [#allocation4]  }
 0x1ef   :  { %447 = dma.done.wait [#allocation4], 16  }
 0x1f0   :  { %448 = vsyncadd [#allocation4], 4294967280 }
 0x1f1   :  { %352 = vsyncpa [#allocation4], 1 }

</bundles_post_ra>
